<compile_context>
chip_gen: v5e
topology: v5e:2x2
jax: 0.10.0
libtpu: 0.0.40
codegen_flags: <defaults>
</compile_context>

<pallas_src>
import functools
import math

import jax
import jax.numpy as jnp
from jax import lax
from jax.experimental import pallas as pl
from jax.experimental.pallas import tpu as pltpu


def _round_up(x: int, m: int) -> int:
    return ((x + m - 1) // m) * m


def _tile_config():
    """Per-TPU-generation tile sizes and scoped-VMEM limit."""
    kind = ""
    try:
        kind = jax.devices()[0].device_kind.lower()
    except Exception:  # pragma: no cover - defensive; fall back to safe config
        pass
    if "v7" in kind:
        # v7x: 64 MiB VMEM per TensorCore -> keep footprint modest.
        return dict(tm=512, tn=512, tk=1024, vmem=48 * 1024 * 1024, multi_core=True)
    if "v6" in kind:
        # v6e: 128 MiB VMEM, needs ~655 flop/byte -> big output tiles.
        return dict(tm=1024, tn=1024, tk=1024, vmem=96 * 1024 * 1024, multi_core=False)
    if "v5" in kind:
        # v5e: ~240 flop/byte threshold, 512x512 tiles are enough.
        return dict(tm=512, tn=512, tk=1024, vmem=64 * 1024 * 1024, multi_core=False)
    # Unknown generation: conservative config that fits 64 MiB VMEM.
    return dict(tm=512, tn=512, tk=512, vmem=48 * 1024 * 1024, multi_core=True)


def _pick_tm(m: int, tm_max: int, sublane: int) -> int:
    """Pick tm minimizing padded-M waste while keeping large tiles."""
    if m <= tm_max:
        return max(sublane, _round_up(m, sublane))
    cands = {tm_max, (3 * tm_max) // 4, tm_max // 2, tm_max // 4, 256, 128}
    cands = [c for c in cands if c >= 128 and c % sublane == 0 and c <= tm_max]
    if not cands:
        return tm_max
    # Primary: minimize total padded work; tie-break: prefer the larger tile.
    return min(cands, key=lambda c: (_round_up(m, c), -c))


def _weight_tiles(dim_out: int, dim_in: int, cfg):
    """Weight-side tiling (independent of M): tn, tk and padded N, K."""
    tn = min(cfg["tn"], _round_up(dim_out, 128))
    tk = min(cfg["tk"], _round_up(dim_in, 128))
    n_pad = _round_up(dim_out, tn)
    k_pad = _round_up(dim_in, tk)
    return tn, tk, n_pad, k_pad


def prepare_linear_weights(weights: jax.Array):
    """One-time weight padding (hoists the per-call jnp.pad out of the hot path).

    Returns (padded_weights, dim_out, dim_in); pass all three to linear_forward.
    """
    dim_out, dim_in = weights.shape
    cfg = _tile_config()
    _, _, n_pad, k_pad = _weight_tiles(dim_out, dim_in, cfg)
    if (n_pad, k_pad) != (dim_out, dim_in):
        weights = jnp.pad(weights, ((0, n_pad - dim_out), (0, k_pad - dim_in)))
    return weights, dim_out, dim_in


def _linear_kernel(x_ref, w_ref, o_ref, acc_ref, *, cast_bf16: bool):
    # x_ref: (tm, tk) input tile
    # w_ref: (tn, tk) weight tile in native (dim_out, dim_in) layout
    # o_ref: (tm, tn) output tile
    # acc_ref: (tm, tn) float32 accumulator (persists across the K grid axis)
    @pl.when(pl.program_id(2) == 0)
    def _():
        acc_ref[...] = jnp.zeros_like(acc_ref)

    x = x_ref[...]
    w = w_ref[...]
    if cast_bf16:
        x = x.astype(jnp.bfloat16)
        w = w.astype(jnp.bfloat16)

    # Contract dim 1 of both operands: (tm, tk) . (tn, tk) -> (tm, tn).
    # Lowered as an MXU matmul with transposed RHS; no XLU transpose.
    acc_ref[...] += lax.dot_general(
        x,
        w,
        dimension_numbers=(((1,), (1,)), ((), ())),
        preferred_element_type=jnp.float32,
    )

    @pl.when(pl.program_id(2) == pl.num_programs(2) - 1)
    def _():
        o_ref[...] = acc_ref[...].astype(o_ref.dtype)


def linear_forward(
    x: jax.Array,
    weights: jax.Array,
    *,
    dim_out: int | None = None,
    dim_in: int | None = None,
    use_bf16: bool = False,
) -> jax.Array:
    """y = einsum('... k, n k -> ... n', x, weights); weights: (dim_out, dim_in).

    If weights were pre-padded via prepare_linear_weights, pass the true
    dim_out / dim_in explicitly.  Set use_bf16=True to run the MXU in bf16
    (f32 accumulation) for f32 inputs -- slightly different numerics.
    """
    if dim_out is None or dim_in is None:
        dim_out, dim_in = weights.shape
    assert x.shape[-1] == dim_in

    cfg = _tile_config()

    leading = x.shape[:-1]
    m = int(math.prod(leading)) if leading else 1
    x2d = x.reshape(m, dim_in)

    # Sublane granularity for the M tile depends on dtype packing
    # (f32 -> 8, bf16 -> 16, int8/fp8 -> 32).
    sublane = max(8, 32 // jnp.dtype(x.dtype).itemsize)

    tn, tk, n_pad, k_pad = _weight_tiles(dim_out, dim_in, cfg)
    tm = _pick_tm(m, cfg["tm"], sublane)
    m_pad = _round_up(m, tm)

    # v7x megacore: make sure the parallel (M x N) portion of the grid has at
    # least 2 tiles so both TensorCores get work.  n_pad stays a multiple of
    # the halved tn, so no re-padding is needed.
    if cfg["multi_core"]:
        while (m_pad // tm) * (n_pad // tn) < 2 and tn >= 256 and tn % 256 == 0:
            tn //= 2

    # Pad inputs up to whole tiles (zeros contribute nothing to the dot).
    if (m_pad, k_pad) != (m, dim_in):
        x2d = jnp.pad(x2d, ((0, m_pad - m), (0, k_pad - dim_in)))
    w = weights
    if w.shape != (n_pad, k_pad):
        w = jnp.pad(w, ((0, n_pad - w.shape[0]), (0, k_pad - w.shape[1])))

    grid = (m_pad // tm, n_pad // tn, k_pad // tk)

    # Tiled access pattern: x is streamed once per N tile, W once per M tile.
    x_bytes = m_pad * k_pad * x2d.dtype.itemsize * grid[1]
    w_bytes = n_pad * k_pad * w.dtype.itemsize * grid[0]
    o_bytes = m_pad * n_pad * jnp.dtype(x.dtype).itemsize
    cost = pl.CostEstimate(
        flops=2 * m_pad * n_pad * k_pad,
        transcendentals=0,
        bytes_accessed=x_bytes + w_bytes + o_bytes,
    )

    kernel = functools.partial(_linear_kernel, cast_bf16=bool(use_bf16))

    out2d = pl.pallas_call(
        kernel,
        out_shape=jax.ShapeDtypeStruct((m_pad, n_pad), x.dtype),
        grid_spec=pltpu.PrefetchScalarGridSpec(
            num_scalar_prefetch=0,
            grid=grid,
            in_specs=[
                pl.BlockSpec((tm, tk), lambda i, j, k: (i, k)),
                pl.BlockSpec((tn, tk), lambda i, j, k: (j, k)),
            ],
            out_specs=pl.BlockSpec((tm, tn), lambda i, j, k: (i, j)),
            scratch_shapes=[pltpu.VMEM((tm, tn), jnp.float32)],
        ),
        compiler_params=pltpu.CompilerParams(
            dimension_semantics=("parallel", "parallel", "arbitrary"),
            vmem_limit_bytes=cfg["vmem"],
        ),
        cost_estimate=cost,
    )(x2d, w)

    return out2d[:m, :dim_out].reshape(*leading, dim_out)


def init_linear_weights(key, dim_in: int, dim_out: int, dtype=jnp.float32) -> jax.Array:
    """Matches torch.nn.init.trunc_normal_(mean=0, std=sqrt(var), a=-3*var, b=3*var)
    with var = 2 / (dim_in + dim_out), exactly as in the PyTorch module (the
    truncation bounds are +-3*variance in absolute units, per the spec)."""
    variance = 2.0 / (dim_in + dim_out)
    std = math.sqrt(variance)
    lo = (-3.0 * variance) / std
    hi = (3.0 * variance) / std
    w = jax.random.truncated_normal(key, lo, hi, shape=(dim_out, dim_in)) * std
    return w.astype(dtype)


if __name__ == "__main__":
    key = jax.random.PRNGKey(0)
    k_w, k_x = jax.random.split(key)

    batch, seq, dim_in, dim_out = 2, 8, 32, 64

    weights = init_linear_weights(k_w, dim_in, dim_out)
    x = jax.random.normal(k_x, (batch, seq, dim_in), dtype=jnp.float32)

    # Hot-path usage: pad the weight once, reuse on every forward.
    w_prepped, d_out, d_in = prepare_linear_weights(weights)
    y = linear_forward(x, w_prepped, dim_out=d_out, dim_in=d_in)
    y = jax.block_until_ready(y)

    # Reference check in plain JAX.
    y_ref = jnp.einsum("bsi,oi->bso", x, weights)
    assert y.shape == (batch, seq, dim_out)
    assert jnp.allclose(y, y_ref, atol=1e-5, rtol=1e-5)

    # Also exercise the plain (unprepared-weight) path.
    y2 = jax.block_until_ready(linear_forward(x, weights))
    assert jnp.allclose(y2, y_ref, atol=1e-5, rtol=1e-5)

    print("KERNEL_OK")
</pallas_src>

<mosaic_0001>
module attributes {stable_mosaic.version = 11 : i64} {
  func.func @_linear_kernel(%arg0: i32, %arg1: i32, %arg2: i32, %arg3: memref<16x128xf32, #tpu.memory_space<vmem>>, %arg4: memref<128x128xf32, #tpu.memory_space<vmem>>, %arg5: memref<16x128xf32, #tpu.memory_space<vmem>>, %arg6: memref<16x128xf32, #tpu.memory_space<vmem>>) attributes {dimension_semantics = [#tpu.dimension_semantics<parallel>, #tpu.dimension_semantics<parallel>, #tpu.dimension_semantics<arbitrary>], iteration_bounds = array<i64: 1, 1, 1>, scalar_prefetch = 0 : i64, scratch_operands = 1 : i64, tpu.core_type = #tpu.core_type<tc>, window_params = [{transform_indices = @transform_0, window_bounds = array<i64: 16, 128>}, {transform_indices = @transform_1, window_bounds = array<i64: 128, 128>}, {transform_indices = @transform_2, window_bounds = array<i64: 16, 128>}]} {
    %c0_i32 = arith.constant 0 : i32
    %0 = arith.cmpi eq, %arg2, %c0_i32 : i32
    %1 = arith.extui %0 : i1 to i32
    %c0_i32_0 = arith.constant 0 : i32
    %2 = arith.cmpi ne, %1, %c0_i32_0 : i32
    scf.if %2 {
      %cst_10 = arith.constant 0.000000e+00 : f32
      %12 = vector.broadcast %cst_10 : f32 to vector<16x128xf32>
      %c0_11 = arith.constant 0 : index
      %c0_12 = arith.constant 0 : index
      %13 = vector.load %arg6[%c0_11, %c0_12] : memref<16x128xf32, #tpu.memory_space<vmem>>, vector<16x128xf32>
      tpu.vector_store %arg6[%c0_11, %c0_12], %12 {strides = array<i32>} : memref<16x128xf32, #tpu.memory_space<vmem>>, vector<16x128xf32>,
    } else {
    }
    %c0 = arith.constant 0 : index
    %c0_1 = arith.constant 0 : index
    %3 = vector.load %arg3[%c0, %c0_1] : memref<16x128xf32, #tpu.memory_space<vmem>>, vector<16x128xf32>
    %c0_2 = arith.constant 0 : index
    %c0_3 = arith.constant 0 : index
    %4 = vector.load %arg4[%c0_2, %c0_3] : memref<128x128xf32, #tpu.memory_space<vmem>>, vector<128x128xf32>
    %c0_4 = arith.constant 0 : index
    %c0_5 = arith.constant 0 : index
    %5 = vector.load %arg6[%c0_4, %c0_5] : memref<16x128xf32, #tpu.memory_space<vmem>>, vector<16x128xf32>
    %cst = arith.constant dense<0.000000e+00> : vector<16x128xf32>
    %6 = tpu.matmul %3, %4, %cst {dimension_numbers = #tpu.dot_dimension_numbers<[1], [1], [0], [0], [0, 0, 1, 0], [], []>} : vector<16x128xf32>, vector<128x128xf32>, vector<16x128xf32> -> vector<16x128xf32>
    %7 = arith.addf %5, %6 : vector<16x128xf32>
    %c0_6 = arith.constant 0 : index
    %c0_7 = arith.constant 0 : index
    %8 = vector.load %arg6[%c0_6, %c0_7] : memref<16x128xf32, #tpu.memory_space<vmem>>, vector<16x128xf32>
    tpu.vector_store %arg6[%c0_6, %c0_7], %7 {strides = array<i32>} : memref<16x128xf32, #tpu.memory_space<vmem>>, vector<16x128xf32>,
    %c0_i32_8 = arith.constant 0 : i32
    %9 = arith.cmpi eq, %arg2, %c0_i32_8 : i32
    %10 = arith.extui %9 : i1 to i32
    %c0_i32_9 = arith.constant 0 : i32
    %11 = arith.cmpi ne, %10, %c0_i32_9 : i32
    scf.if %11 {
      %c0_10 = arith.constant 0 : index
      %c0_11 = arith.constant 0 : index
      %12 = vector.load %arg6[%c0_10, %c0_11] : memref<16x128xf32, #tpu.memory_space<vmem>>, vector<16x128xf32>
      %c0_12 = arith.constant 0 : index
      %c0_13 = arith.constant 0 : index
      %13 = vector.load %arg5[%c0_12, %c0_13] : memref<16x128xf32, #tpu.memory_space<vmem>>, vector<16x128xf32>
      tpu.vector_store %arg5[%c0_12, %c0_13], %12 {strides = array<i32>} : memref<16x128xf32, #tpu.memory_space<vmem>>, vector<16x128xf32>,
    } else {
    }
    return
  }
  func.func @transform_0(%arg0: i32, %arg1: i32, %arg2: i32) -> (i32, i32) {
    %c0_i32 = arith.constant 0 : i32
    return %arg0, %arg2 : i32, i32
  }
  func.func @transform_1(%arg0: i32, %arg1: i32, %arg2: i32) -> (i32, i32) {
    %c0_i32 = arith.constant 0 : i32
    return %arg1, %arg2 : i32, i32
  }
  func.func @transform_2(%arg0: i32, %arg1: i32, %arg2: i32) -> (i32, i32) {
    %c0_i32 = arith.constant 0 : i32
    return %arg0, %arg1 : i32, i32
  }
}

</mosaic_0001>

<bundles_post_ra>
// kernel: tpu_custom_call.1
= control target key start
LH: loop header
LB: loop body
LE: loop exit
PB: predicated region body
PF: predicated region fallthrough
CT: control target
= control target key end

     0   :  { %7 = vsyncpa [#allocation4], 0  ;;  %s261_s0 = inlined_call_operand.hbm [shape: f32[16,128], index: 0, kind: input, shape index: {}]   ;;  %s262_s1 = inlined_call_operand.hbm [shape: f32[128,128], index: 1, kind: input, shape index: {}]   ;;  %s263_s2 = inlined_call_operand.hbm [shape: f32[16,128], index: 2, kind: output, shape index: {}]  }
   0x1   :  { %8 = vsyncpa [#allocation7], 0 }
   0x2   :  { %9 = vsyncpa [#allocation5], 0  ;;  %s14_s11 = sshll.u32 %s261_s0, 4  ;;  %s223_s12 = smov [#allocation3]   ;;  %s15_s11 = int_to_ptr.hbm [resolvable:$true] %s14_s11 }
   0x3   :  { %s16_s13 = sshll.u32 %s223_s12, 4  ;;  %s27_s16 = sshll.u32 %s262_s1, 4  ;;  %s17_s13 = int_to_ptr.vmem [resolvable:$true] %s16_s13  ;;  %s28_s16 = int_to_ptr.hbm [resolvable:$true] %s27_s16 }
   0x4   :  { %s224_s17 = smov 128   ;;  %s225_s18 = smov 8  }
   0x5   :  { %22 = dma.hbm_to_vmem [thread:$0]  %s15_s11, 256, %s17_s13, [#allocation4], %s224_s17, %s224_s17, %s225_s18  }
   0x6   :  { %s226_s19 = smov [#allocation6]  }
   0x7   :  { %s29_s20 = sshll.u32 %s226_s19, 4  ;;  %s30_s20 = int_to_ptr.vmem [resolvable:$true] %s29_s20 }
   0x8   :  { %35 = dma.hbm_to_vmem [thread:$0]  %s28_s16, 2048, %s30_s20, [#allocation7], %s224_s17, %s224_s17, %s225_s18  }
   0x9   :  { %217 = dma.done.wait [#allocation4], 256  }
   0xa   :  { %218 = vsyncadd [#allocation4], 4294967040 }
   0xb   :  { %219 = dma.done.wait [#allocation7], 2048  }
   0xc   :  { %220 = vsyncadd [#allocation7], 4294965248  ;;  %v67_v0 = vld [vmem:[#allocation6 + $0x78] sm:$0xff]  ;;  %v66_v1 = vld [vmem:[#allocation6 + $0x70] sm:$0xff]  ;;  %s227_s0 = smov [#allocation8]   ;;  %s110_s23 = sshll.u32 %s263_s2, 4  ;;  %s111_s23 = int_to_ptr.hbm [resolvable:$true] %s110_s23 }
   0xd   :  { %70 = vmatpush.xpose.msra.mxu0 %v67_v0  ;;  %124 = vmatpush.xpose.msra.mxu1 %v67_v0  ;;  %v65_v2 = vld [vmem:[#allocation6 + $0x68] sm:$0xff]  ;;  %v64_v3 = vld [vmem:[#allocation6 + $0x60] sm:$0xff]  ;;  %v63_v4 = vld [vmem:[#allocation6 + $0x58] sm:$0xff]  ;;  %s108_s1 = sshll.u32 %s227_s0, 4  ;;  %s109_s1 = int_to_ptr.vmem [resolvable:$true] %s108_s1 }
   0xe   :  { %v62_v5 = vld [vmem:[#allocation6 + $0x50] sm:$0xff]  ;;  %v61_v6 = vld [vmem:[#allocation6 + $0x48] sm:$0xff]  ;;  %v60_v7 = vld [vmem:[#allocation6 + $0x40] sm:$0xff] }
   0xf   :  { %v59_v8 = vld [vmem:[#allocation6 + $0x38] sm:$0xff]  ;;  %v58_v9 = vld [vmem:[#allocation6 + $0x30] sm:$0xff]  ;;  %v57_v10 = vld [vmem:[#allocation6 + $0x28] sm:$0xff] }
  0x10   :  { %v56_v11 = vld [vmem:[#allocation6 + $0x20] sm:$0xff]  ;;  %v55_v12 = vld [vmem:[#allocation6 + $0x18] sm:$0xff]  ;;  %v54_v13 = vld [vmem:[#allocation6 + $0x10] sm:$0xff] }
  0x11   :  { %71 = vmatpush.xpose.msra.mxu0 %v66_v1  ;;  %125 = vmatpush.xpose.msra.mxu1 %v66_v1  ;;  %v53_v14 = vld [vmem:[#allocation6 + $0x8] sm:$0xff]  ;;  %v52_v15 = vld [vmem:[#allocation6] sm:$0xff]  ;;  %v50_v16 = vld [vmem:[#allocation3] sm:$0xff] }
  0x12   :  { %v51_v17 = vld [vmem:[#allocation3 + $0x8] sm:$0xff] }
  0x15   :  { %72 = vmatpush.xpose.msra.mxu0 %v65_v2  ;;  %126 = vmatpush.xpose.msra.mxu1 %v65_v2 }
  0x19   :  { %73 = vmatpush.xpose.msra.mxu0 %v64_v3  ;;  %127 = vmatpush.xpose.msra.mxu1 %v64_v3 }
  0x1d   :  { %74 = vmatpush.xpose.msra.mxu0 %v63_v4  ;;  %128 = vmatpush.xpose.msra.mxu1 %v63_v4 }
  0x21   :  { %75 = vmatpush.xpose.msra.mxu0 %v62_v5  ;;  %129 = vmatpush.xpose.msra.mxu1 %v62_v5 }
  0x25   :  { %76 = vmatpush.xpose.msra.mxu0 %v61_v6  ;;  %130 = vmatpush.xpose.msra.mxu1 %v61_v6 }
  0x29   :  { %77 = vmatpush.xpose.msra.mxu0 %v60_v7  ;;  %131 = vmatpush.xpose.msra.mxu1 %v60_v7 }
  0x2d   :  { %78 = vmatpush.xpose.msra.mxu0 %v59_v8  ;;  %132 = vmatpush.xpose.msra.mxu1 %v59_v8 }
  0x31   :  { %79 = vmatpush.xpose.msra.mxu0 %v58_v9  ;;  %133 = vmatpush.xpose.msra.mxu1 %v58_v9 }
  0x35   :  { %80 = vmatpush.xpose.msra.mxu0 %v57_v10  ;;  %134 = vmatpush.xpose.msra.mxu1 %v57_v10 }
  0x39   :  { %81 = vmatpush.xpose.msra.mxu0 %v56_v11  ;;  %135 = vmatpush.xpose.msra.mxu1 %v56_v11 }
  0x3d   :  { %82 = vmatpush.xpose.msra.mxu0 %v55_v12  ;;  %136 = vmatpush.xpose.msra.mxu1 %v55_v12 }
  0x41   :  { %83 = vmatpush.xpose.msra.mxu0 %v54_v13  ;;  %137 = vmatpush.xpose.msra.mxu1 %v54_v13 }
  0x45   :  { %84 = vmatpush.xpose.msra.mxu0 %v53_v14  ;;  %138 = vmatpush.xpose.msra.mxu1 %v53_v14 }
  0x49   :  { %85 = vmatpush.xpose.msra.mxu0 %v52_v15  ;;  %139 = vmatpush.xpose.msra.mxu1 %v52_v15 }
  0x4c   :  { %86 = vmatmul.f32.vlgmr.msra.gmra.mxu0 %v50_v16  ;;  %89 = vmatmul.f32.vlgmr.msra.gmra.mxu1 %v51_v17 }
  0xc9   :  { %v87_v18 = vpop.f32.mrf.mxu0  ;;  %v90_v19 = vpop.f32.mrf.mxu1 }
  0xca   :  { %102 = vst [vmem:[#allocation8] sm:$0xff] %v87_v18 }
  0xcb   :  { %103 = vst [vmem:[#allocation8 + $0x8] sm:$0xff] %v90_v19 }
  0xcc   :  { %116 = dma.vmem_to_hbm [thread:$0]  %s109_s1, 256, %s111_s23, [#allocation5], %s224_s17, %s224_s17, %s225_s18  }
  0xcd   :  { %221 = dma.done.wait [#allocation5], 256  }
  0xce   :  { %222 = vsyncadd [#allocation5], 4294967040 }
  0xcf   :  { %121 = vsyncpa [#allocation4], 1 }
  0xd0   :  { %122 = vsyncpa [#allocation7], 1 }
  0xd1   :  { %123 = vsyncpa [#allocation5], 1 }

</bundles_post_ra>
